<compile_context>
chip_gen: v7x
topology: tpu7x:2x2x1
jax: 0.10.0
libtpu: 0.0.40
codegen_flags: <defaults>
</compile_context>

<pallas_src>
import collections
import functools

import jax
import jax.numpy as jnp
from jax.experimental import pallas as pl
from jax.experimental.pallas import tpu as pltpu

_EPS = 1e-5
_VMEM_BUDGET = 20 * 1024 * 1024          # per-step working-set target (v7x-safe)
_COMPILER_PARAMS = pltpu.CompilerParams(
    dimension_semantics=("parallel", "parallel"),
    vmem_limit_bytes=32 * 1024 * 1024)

_Geom = collections.namedtuple(
    "_Geom", ["wp", "hp", "Lp", "L_out", "halo_pad", "tile_l", "tiles",
              "l_pad_out", "Lstore", "offsets", "ratio"])


# =============================================================================
# Geometry
# =============================================================================
def _round_up(x, m):
    return -(-x // m) * m


def _vmem_step_bytes(cin, cout, tile_l, halo_pad):
    window = cin * (tile_l + halo_pad) * 2          # bf16 window temp
    rhs = 9 * cin * tile_l * 2                      # folded im2col temp (bf16)
    acc = cout * tile_l * 4                         # f32 accumulator
    a_in = 2 * cin * tile_l * 2                     # double-buffered A block
    b_in = 2 * cin * halo_pad * 2                   # double-buffered halo block
    y_out = 2 * cout * tile_l * 4                   # double-buffered output
    w = 2 * cout * 9 * cin * 2
    m = 2 * tile_l * 4
    return window + rhs + acc + a_in + b_in + y_out + w + m


def _geometry(h, w, cin, cout_max):
    wp, hp = w + 2, h + 2
    Lp = hp * wp                      # reflection-padded image, flattened
    L_out = h * wp                    # window-start domain (incl. 2 junk cols/row)
    halo = 2 * wp + 2                 # extra input past a tile needed by 3x3 taps
    halo_pad = _round_up(halo, 128)
    # tile_l: lane-dense multiple of halo_pad (so the halo block is Block-
    # indexable), ~8*wp to keep halo overhead small, >=2 tiles (v7x 2 TCs),
    # capped so the per-step working set fits comfortably in VMEM.
    tile_l = _round_up(max(512, 8 * wp), halo_pad)
    tile_l = min(tile_l, max(halo_pad, _round_up(-(-L_out // 2), halo_pad)))
    while (tile_l > halo_pad and
           _vmem_step_bytes(cin, cout_max, tile_l, halo_pad) > _VMEM_BUDGET):
        tile_l -= halo_pad
    tiles = -(-L_out // tile_l)
    l_pad_out = tiles * tile_l
    Lstore = l_pad_out + halo_pad     # stored activation length (image + tail)
    offsets = tuple(kh * wp + kw for kh in range(3) for kw in range(3))
    return _Geom(wp, hp, Lp, L_out, halo_pad, tile_l, tiles, l_pad_out, Lstore,
                 offsets, tile_l // halo_pad)


# =============================================================================
# Pallas conv kernels
# =============================================================================
def _make_conv_kernel(offsets, tile_l, *, fold, stats, with_relu):
    """conv3x3 over the flattened padded image, per (batch, tile) grid step.

    xa_ref : (Cin, TILE_L)    bf16  block t of the padded-flat activation
    xb_ref : (Cin, HALO_PAD)  bf16  halo block starting at (t+1)*TILE_L
    w_ref  : (Cout, 9*Cin) or (9, Cout, Cin)  bf16
    stats: also emit per-tile [sum, sum^2] over valid pixels (masked).
    """

    def conv(xa_ref, xb_ref, w_ref):
        window = jnp.concatenate([xa_ref[...], xb_ref[...]], axis=1)
        if fold:
            # in-kernel im2col: fold the 9 taps into the MXU K dimension.
            rhs = jnp.concatenate(
                [window[:, off:off + tile_l] for off in offsets], axis=0)
            return jnp.dot(w_ref[...], rhs, preferred_element_type=jnp.float32)
        acc = jnp.zeros((w_ref.shape[1], tile_l), jnp.float32)
        for k, off in enumerate(offsets):
            acc = acc + jnp.dot(w_ref[k], window[:, off:off + tile_l],
                                preferred_element_type=jnp.float32)
        return acc

    if stats:
        def kernel(xa_ref, xb_ref, w_ref, m_ref, y_ref, s_ref):
            acc = conv(xa_ref, xb_ref, w_ref)
            y_ref[...] = acc.astype(y_ref.dtype)
            ym = acc * m_ref[...]                       # mask out junk columns
            s_ref[:, 0:1] = jnp.sum(ym, axis=1, keepdims=True)
            s_ref[:, 1:2] = jnp.sum(acc * ym, axis=1, keepdims=True)
        return kernel

    def kernel(xa_ref, xb_ref, w_ref, b_ref, y_ref):
        acc = conv(xa_ref, xb_ref, w_ref) + b_ref[...]
        if with_relu:
            acc = jnp.maximum(acc, 0.0)
        y_ref[...] = acc.astype(y_ref.dtype)
    return kernel


def _conv_pass(x_padded, w_torch, geom, *, stats, mask=None, bias=None,
               relu=False, out_dtype=jnp.bfloat16):
    """One tiled conv pass over the persistent padded-flat activation."""
    n, cin, _ = x_padded.shape
    cout = w_torch.shape[0]                              # torch (Cout,Cin,3,3)

    # Fold the 9 taps into K when Cin aligns with bf16 sublane packing.
    fold = (cin % 16 == 0)
    if fold:
        w_arg = jnp.transpose(w_torch, (0, 2, 3, 1)).reshape(cout, 9 * cin)
        w_spec = pl.BlockSpec((cout, 9 * cin), lambda i, t: (0, 0))
    else:
        w_arg = jnp.transpose(w_torch, (2, 3, 0, 1)).reshape(9, cout, cin)
        w_spec = pl.BlockSpec((9, cout, cin), lambda i, t: (0, 0, 0))
    w_arg = w_arg.astype(jnp.bfloat16)

    ratio = geom.ratio
    grid = (n, geom.tiles)
    xa_spec = pl.BlockSpec((None, cin, geom.tile_l), lambda i, t: (i, 0, t))
    xb_spec = pl.BlockSpec((None, cin, geom.halo_pad),
                           lambda i, t: (i, 0, (t + 1) * ratio))
    y_spec = pl.BlockSpec((None, cout, geom.tile_l), lambda i, t: (i, 0, t))

    if stats:
        m_spec = pl.BlockSpec((1, geom.tile_l), lambda i, t: (0, t))
        s_spec = pl.BlockSpec((None, None, cout, 2), lambda i, t: (i, t, 0, 0))
        return pl.pallas_call(
            _make_conv_kernel(geom.offsets, geom.tile_l, fold=fold, stats=True,
                              with_relu=False),
            grid=grid,
            in_specs=[xa_spec, xb_spec, w_spec, m_spec],
            out_specs=(y_spec, s_spec),
            out_shape=(jax.ShapeDtypeStruct((n, cout, geom.l_pad_out), out_dtype),
                       jax.ShapeDtypeStruct((n, geom.tiles, cout, 2),
                                            jnp.float32)),
            compiler_params=_COMPILER_PARAMS,
        )(x_padded, x_padded, w_arg, mask)

    b2 = bias.reshape(cout, 1).astype(jnp.float32)
    b_spec = pl.BlockSpec((cout, 1), lambda i, t: (0, 0))
    return pl.pallas_call(
        _make_conv_kernel(geom.offsets, geom.tile_l, fold=fold, stats=False,
                          with_relu=relu),
        grid=grid,
        in_specs=[xa_spec, xb_spec, w_spec, b_spec],
        out_specs=y_spec,
        out_shape=jax.ShapeDtypeStruct((n, cout, geom.l_pad_out), out_dtype),
        compiler_params=_COMPILER_PARAMS,
    )(x_padded, x_padded, w_arg, b2)


# =============================================================================
# Layout / BN glue (fused XLA elementwise+pad, one read+write per conv output)
# =============================================================================
def _valid_mask(geom, h, w):
    l = jnp.arange(geom.l_pad_out)
    valid = (l < h * geom.wp) & ((l % geom.wp) < w)
    return valid.astype(jnp.float32)[None, :]            # (1, l_pad_out)


def _to_padded_flat(x_nchw, geom):
    n, c, _, _ = x_nchw.shape
    xp = jnp.pad(x_nchw, ((0, 0), (0, 0), (1, 1), (1, 1)), mode="reflect")
    flat = xp.reshape(n, c, geom.Lp)
    flat = jnp.pad(flat, ((0, 0), (0, 0), (0, geom.Lstore - geom.Lp)))
    return flat.astype(jnp.bfloat16)


def _bn_to_padded(y_flat, scale, shift, geom, h, w, *, relu,
                  residual_padded=None):
    """BN-apply (+relu) (+residual) on the valid conv outputs, reflect-padded
    back into the persistent padded-flat bf16 layout (single fused XLA pass)."""
    # TODO(synk): the reflect-border refresh / +wp+1 re-layout stays in XLA;
    # writing it straight from the conv kernel would need element-offset
    # output blocks, which is not attempted here.
    n, c, _ = y_flat.shape
    y = y_flat[:, :, : h * geom.wp].reshape(n, c, h, geom.wp)[:, :, :, :w]
    y = (y.astype(jnp.float32) * scale[None, :, None, None]
         + shift[None, :, None, None])
    if relu:
        y = jnp.maximum(y, 0.0)
    yp = jnp.pad(y, ((0, 0), (0, 0), (1, 1), (1, 1)), mode="reflect")
    flat = yp.reshape(n, c, geom.Lp)
    flat = jnp.pad(flat, ((0, 0), (0, 0), (0, geom.Lstore - geom.Lp)))
    if residual_padded is not None:
        flat = flat + residual_padded.astype(jnp.float32)
    return flat.astype(jnp.bfloat16)


def _bn_scale_shift(partials, gamma, beta, count):
    """Training-mode BN batch stats from per-tile partial sums (f32)."""
    s = jnp.sum(partials, axis=(0, 1))                   # (Cout, 2)
    mean = s[:, 0] / count
    var = s[:, 1] / count - mean * mean                  # biased variance
    scale = gamma * jax.lax.rsqrt(var + _EPS)
    shift = beta - mean * scale
    return scale, shift


# =============================================================================
# Module forward
# =============================================================================
def _residual_block(x_padded, p, geom, mask, h, w, count):
    # conv1 -> BN1 -> relu   (conv bias cancels under training-mode BN)
    y1, st1 = _conv_pass(x_padded, p["w1"], geom, stats=True, mask=mask)
    sc1, sh1 = _bn_scale_shift(st1, p["g1"], p["bt1"], count)
    a1 = _bn_to_padded(y1, sc1, sh1, geom, h, w, relu=True)
    # conv2 -> BN2 -> + x
    y2, st2 = _conv_pass(a1, p["w2"], geom, stats=True, mask=mask)
    sc2, sh2 = _bn_scale_shift(st2, p["g2"], p["bt2"], count)
    return _bn_to_padded(y2, sc2, sh2, geom, h, w, relu=False,
                         residual_padded=x_padded)


def _pixel_shuffle_x2_nchw(y_nchw):
    """Exact PyTorch nn.PixelShuffle(2): (N, 4C, H, W) -> (N, C, 2H, 2W)."""
    n, c4, h, w = y_nchw.shape
    c = c4 // 4
    y = y_nchw.reshape(n, c, 2, 2, h, w)
    y = jnp.transpose(y, (0, 1, 4, 2, 5, 3))
    return y.reshape(n, c, 2 * h, 2 * w)


def late_upsampling_block(x_nchw, params, n_res_block):
    n, c, h, w = x_nchw.shape
    geom = _geometry(h, w, c, 4 * c)
    mask = _valid_mask(geom, h, w)
    count = n * h * w
    x = _to_padded_flat(x_nchw.astype(jnp.float32), geom)
    for i in range(n_res_block):
        x = _residual_block(x, params[f"res{i}"], geom, mask, h, w, count)
    up = params["up"]
    # relu commutes with PixelShuffle -> applied inside the conv kernel.
    y = _conv_pass(x, up["w"], geom, stats=False, bias=up["b"], relu=True,
                   out_dtype=jnp.float32)
    y = y[:, :, : h * geom.wp].reshape(n, 4 * c, h, geom.wp)[:, :, :, :w]
    return _pixel_shuffle_x2_nchw(y)                     # (N, F, 2H, 2W)


# =============================================================================
# Deterministic parameter init (shapes from the module's __init__)
# =============================================================================
def init_params(key, features, n_res_block):
    params = {}
    for i in range(n_res_block):
        key, k1, k2, k3, k4, k5, k6, k7, k8 = jax.random.split(key, 9)
        params[f"res{i}"] = dict(
            w1=0.1 * jax.random.normal(k1, (features, features, 3, 3), jnp.float32),
            # b1/b2 exist in the torch module but cancel under training-mode BN.
            b1=0.1 * jax.random.normal(k2, (features,), jnp.float32),
            g1=1.0 + 0.1 * jax.random.normal(k3, (features,), jnp.float32),
            bt1=0.1 * jax.random.normal(k4, (features,), jnp.float32),
            w2=0.1 * jax.random.normal(k5, (features, features, 3, 3), jnp.float32),
            b2=0.1 * jax.random.normal(k6, (features,), jnp.float32),
            g2=1.0 + 0.1 * jax.random.normal(k7, (features,), jnp.float32),
            bt2=0.1 * jax.random.normal(k8, (features,), jnp.float32),
        )
    key, ku1, ku2 = jax.random.split(key, 3)
    params["up"] = dict(
        w=0.1 * jax.random.normal(ku1, (4 * features, features, 3, 3), jnp.float32),
        b=0.1 * jax.random.normal(ku2, (4 * features,), jnp.float32),
    )
    return params


if __name__ == "__main__":
    FEATURES = 16
    N_RES = 2
    N, H, W = 2, 16, 16

    key = jax.random.PRNGKey(0)
    kx, kp = jax.random.split(key)
    x = jax.random.normal(kx, (N, FEATURES, H, W), jnp.float32)   # NCHW input
    params = init_params(kp, FEATURES, N_RES)

    fwd = jax.jit(functools.partial(late_upsampling_block, n_res_block=N_RES))
    out = jax.block_until_ready(fwd(x, params))

    assert out.shape == (N, FEATURES, 2 * H, 2 * W), out.shape
    assert bool(jnp.all(jnp.isfinite(out)))
    print("KERNEL_OK")
</pallas_src>

<mosaic_0001>
module attributes {stable_mosaic.version = 11 : i64} {
  func.func @kernel(%arg0: i32, %arg1: i32, %arg2: memref<1x16x256xbf16, #tpu.memory_space<vmem>>, %arg3: memref<1x16x128xbf16, #tpu.memory_space<vmem>>, %arg4: memref<16x144xbf16, #tpu.memory_space<vmem>>, %arg5: memref<1x256xf32, #tpu.memory_space<vmem>>, %arg6: memref<1x16x256xbf16, #tpu.memory_space<vmem>>, %arg7: memref<1x1x16x2xf32, #tpu.memory_space<vmem>>) attributes {dimension_semantics = [#tpu.dimension_semantics<parallel>, #tpu.dimension_semantics<parallel>], iteration_bounds = array<i64: 2, 2>, scalar_prefetch = 0 : i64, scratch_operands = 0 : i64, tpu.core_type = #tpu.core_type<tc>, window_params = [{transform_indices = @transform_0, window_bounds = array<i64: 1, 16, 256>}, {transform_indices = @transform_1, window_bounds = array<i64: 1, 16, 128>}, {pipeline_mode = #tpu.pipeline_mode<synchronous>, transform_indices = @transform_2, window_bounds = array<i64: 16, 144>}, {transform_indices = @transform_3, window_bounds = array<i64: 1, 256>}, {transform_indices = @transform_4, window_bounds = array<i64: 1, 16, 256>}, {transform_indices = @transform_5, window_bounds = array<i64: 1, 1, 16, 2>}]} {
    %c0 = arith.constant 0 : index
    %c0_0 = arith.constant 0 : index
    %c0_1 = arith.constant 0 : index
    %0 = vector.load %arg2[%c0, %c0_0, %c0_1] : memref<1x16x256xbf16, #tpu.memory_space<vmem>>, vector<1x16x256xbf16>
    %1 = vector.shape_cast %0 : vector<1x16x256xbf16> to vector<16x256xbf16>
    %c0_2 = arith.constant 0 : index
    %c0_3 = arith.constant 0 : index
    %c0_4 = arith.constant 0 : index
    %2 = vector.load %arg3[%c0_2, %c0_3, %c0_4] : memref<1x16x128xbf16, #tpu.memory_space<vmem>>, vector<1x16x128xbf16>
    %3 = vector.shape_cast %2 : vector<1x16x128xbf16> to vector<16x128xbf16>
    %4 = tpu.concatenate %1, %3 in 1 : vector<16x256xbf16>, vector<16x128xbf16> -> vector<16x384xbf16>
    %5 = vector.extract_strided_slice %4 {offsets = [0, 0], sizes = [16, 256], strides = [1, 1]} : vector<16x384xbf16> to vector<16x256xbf16>
    %6 = vector.extract_strided_slice %4 {offsets = [0, 1], sizes = [16, 256], strides = [1, 1]} : vector<16x384xbf16> to vector<16x256xbf16>
    %7 = vector.extract_strided_slice %4 {offsets = [0, 2], sizes = [16, 256], strides = [1, 1]} : vector<16x384xbf16> to vector<16x256xbf16>
    %8 = vector.extract_strided_slice %4 {offsets = [0, 18], sizes = [16, 256], strides = [1, 1]} : vector<16x384xbf16> to vector<16x256xbf16>
    %9 = vector.extract_strided_slice %4 {offsets = [0, 19], sizes = [16, 256], strides = [1, 1]} : vector<16x384xbf16> to vector<16x256xbf16>
    %10 = vector.extract_strided_slice %4 {offsets = [0, 20], sizes = [16, 256], strides = [1, 1]} : vector<16x384xbf16> to vector<16x256xbf16>
    %11 = vector.extract_strided_slice %4 {offsets = [0, 36], sizes = [16, 256], strides = [1, 1]} : vector<16x384xbf16> to vector<16x256xbf16>
    %12 = vector.extract_strided_slice %4 {offsets = [0, 37], sizes = [16, 256], strides = [1, 1]} : vector<16x384xbf16> to vector<16x256xbf16>
    %13 = vector.extract_strided_slice %4 {offsets = [0, 38], sizes = [16, 256], strides = [1, 1]} : vector<16x384xbf16> to vector<16x256xbf16>
    %14 = tpu.concatenate %5, %6, %7, %8, %9, %10, %11, %12, %13 in 0 : vector<16x256xbf16>, vector<16x256xbf16>, vector<16x256xbf16>, vector<16x256xbf16>, vector<16x256xbf16>, vector<16x256xbf16>, vector<16x256xbf16>, vector<16x256xbf16>, vector<16x256xbf16> -> vector<144x256xbf16>
    %c0_5 = arith.constant 0 : index
    %c0_6 = arith.constant 0 : index
    %15 = vector.load %arg4[%c0_5, %c0_6] : memref<16x144xbf16, #tpu.memory_space<vmem>>, vector<16x144xbf16>
    %cst = arith.constant dense<0.000000e+00> : vector<16x256xf32>
    %16 = tpu.matmul %15, %14, %cst {dimension_numbers = #tpu.dot_dimension_numbers<[1], [0], [0], [1], [0, 0, 1, 1], [], []>} : vector<16x144xbf16>, vector<144x256xbf16>, vector<16x256xf32> -> vector<16x256xf32>
    %17 = arith.truncf %16 : vector<16x256xf32> to vector<16x256xbf16>
    %c0_7 = arith.constant 0 : index
    %c0_8 = arith.constant 0 : index
    %c0_9 = arith.constant 0 : index
    %18 = vector.load %arg6[%c0_7, %c0_8, %c0_9] : memref<1x16x256xbf16, #tpu.memory_space<vmem>>, vector<1x16x256xbf16>
    %19 = vector.shape_cast %18 : vector<1x16x256xbf16> to vector<16x256xbf16>
    %20 = vector.shape_cast %17 : vector<16x256xbf16> to vector<1x16x256xbf16>
    tpu.vector_store %arg6[%c0_7, %c0_8, %c0_9], %20 {strides = array<i32>} : memref<1x16x256xbf16, #tpu.memory_space<vmem>>, vector<1x16x256xbf16>,
    %c0_10 = arith.constant 0 : index
    %c0_11 = arith.constant 0 : index
    %21 = vector.load %arg5[%c0_10, %c0_11] : memref<1x256xf32, #tpu.memory_space<vmem>>, vector<1x256xf32>
    %22 = vector.broadcast %21 : vector<1x256xf32> to vector<16x256xf32>
    %23 = arith.mulf %16, %22 : vector<16x256xf32>
    %cst_12 = arith.constant dense<0.000000e+00> : vector<16xf32>
    %24 = vector.multi_reduction <add>, %23, %cst_12 [1] : vector<16x256xf32> to vector<16xf32>
    %25 = vector.shape_cast %24 : vector<16xf32> to vector<16x1xf32>
    %c0_13 = arith.constant 0 : index
    %c0_14 = arith.constant 0 : index
    %c0_15 = arith.constant 0 : index
    %c0_16 = arith.constant 0 : index
    %26 = vector.load %arg7[%c0_13, %c0_14, %c0_15, %c0_16] : memref<1x1x16x2xf32, #tpu.memory_space<vmem>>, vector<1x1x16x1xf32>
    %27 = vector.shape_cast %26 : vector<1x1x16x1xf32> to vector<16x1xf32>
    %28 = vector.shape_cast %25 : vector<16x1xf32> to vector<1x1x16x1xf32>
    tpu.vector_store %arg7[%c0_13, %c0_14, %c0_15, %c0_16], %28 {strides = array<i32>} : memref<1x1x16x2xf32, #tpu.memory_space<vmem>>, vector<1x1x16x1xf32>,
    %29 = arith.mulf %16, %23 : vector<16x256xf32>
    %cst_17 = arith.constant dense<0.000000e+00> : vector<16xf32>
    %30 = vector.multi_reduction <add>, %29, %cst_17 [1] : vector<16x256xf32> to vector<16xf32>
    %31 = vector.shape_cast %30 : vector<16xf32> to vector<16x1xf32>
    %c0_18 = arith.constant 0 : index
    %c0_19 = arith.constant 0 : index
    %c0_20 = arith.constant 0 : index
    %c1 = arith.constant 1 : index
    %32 = vector.load %arg7[%c0_18, %c0_19, %c0_20, %c1] : memref<1x1x16x2xf32, #tpu.memory_space<vmem>>, vector<1x1x16x1xf32>
    %33 = vector.shape_cast %32 : vector<1x1x16x1xf32> to vector<16x1xf32>
    %34 = vector.shape_cast %31 : vector<16x1xf32> to vector<1x1x16x1xf32>
    tpu.vector_store %arg7[%c0_18, %c0_19, %c0_20, %c1], %34 {strides = array<i32>} : memref<1x1x16x2xf32, #tpu.memory_space<vmem>>, vector<1x1x16x1xf32>,
    return
  }
  func.func @transform_0(%arg0: i32, %arg1: i32) -> (i32, i32, i32) {
    %c0_i32 = arith.constant 0 : i32
    %c0_i32_0 = arith.constant 0 : i32
    return %arg0, %c0_i32, %arg1 : i32, i32, i32
  }
  func.func @transform_1(%arg0: i32, %arg1: i32) -> (i32, i32, i32) {
    %c1_i32 = arith.constant 1 : i32
    %0 = arith.addi %arg1, %c1_i32 : i32
    %c2_i32 = arith.constant 2 : i32
    %1 = arith.muli %0, %c2_i32 : i32
    %c0_i32 = arith.constant 0 : i32
    %c0_i32_0 = arith.constant 0 : i32
    return %arg0, %c0_i32, %1 : i32, i32, i32
  }
  func.func @transform_2(%arg0: i32, %arg1: i32) -> (i32, i32) {
    %c0_i32 = arith.constant 0 : i32
    %c0_i32_0 = arith.constant 0 : i32
    %c0_i32_1 = arith.constant 0 : i32
    return %c0_i32, %c0_i32_0 : i32, i32
  }
  func.func @transform_3(%arg0: i32, %arg1: i32) -> (i32, i32) {
    %c0_i32 = arith.constant 0 : i32
    %c0_i32_0 = arith.constant 0 : i32
    return %c0_i32, %arg1 : i32, i32
  }
  func.func @transform_4(%arg0: i32, %arg1: i32) -> (i32, i32, i32) {
    %c0_i32 = arith.constant 0 : i32
    %c0_i32_0 = arith.constant 0 : i32
    return %arg0, %c0_i32, %arg1 : i32, i32, i32
  }
  func.func @transform_5(%arg0: i32, %arg1: i32) -> (i32, i32, i32, i32) {
    %c0_i32 = arith.constant 0 : i32
    %c0_i32_0 = arith.constant 0 : i32
    %c0_i32_1 = arith.constant 0 : i32
    return %arg0, %arg1, %c0_i32, %c0_i32_0 : i32, i32, i32, i32
  }
}

module attributes {stable_mosaic.version = 11 : i64} {
  func.func @kernel(%arg0: i32, %arg1: i32, %arg2: memref<1x16x256xbf16, #tpu.memory_space<vmem>>, %arg3: memref<1x16x128xbf16, #tpu.memory_space<vmem>>, %arg4: memref<64x144xbf16, #tpu.memory_space<vmem>>, %arg5: memref<64x1xf32, #tpu.memory_space<vmem>>, %arg6: memref<1x64x256xf32, #tpu.memory_space<vmem>>) attributes {dimension_semantics = [#tpu.dimension_semantics<parallel>, #tpu.dimension_semantics<parallel>], iteration_bounds = array<i64: 2, 2>, scalar_prefetch = 0 : i64, scratch_operands = 0 : i64, tpu.core_type = #tpu.core_type<tc>, window_params = [{transform_indices = @transform_0, window_bounds = array<i64: 1, 16, 256>}, {transform_indices = @transform_1, window_bounds = array<i64: 1, 16, 128>}, {pipeline_mode = #tpu.pipeline_mode<synchronous>, transform_indices = @transform_2, window_bounds = array<i64: 64, 144>}, {pipeline_mode = #tpu.pipeline_mode<synchronous>, transform_indices = @transform_3, window_bounds = array<i64: 64, 1>}, {transform_indices = @transform_4, window_bounds = array<i64: 1, 64, 256>}]} {
    %c0 = arith.constant 0 : index
    %c0_0 = arith.constant 0 : index
    %c0_1 = arith.constant 0 : index
    %0 = vector.load %arg2[%c0, %c0_0, %c0_1] : memref<1x16x256xbf16, #tpu.memory_space<vmem>>, vector<1x16x256xbf16>
    %1 = vector.shape_cast %0 : vector<1x16x256xbf16> to vector<16x256xbf16>
    %c0_2 = arith.constant 0 : index
    %c0_3 = arith.constant 0 : index
    %c0_4 = arith.constant 0 : index
    %2 = vector.load %arg3[%c0_2, %c0_3, %c0_4] : memref<1x16x128xbf16, #tpu.memory_space<vmem>>, vector<1x16x128xbf16>
    %3 = vector.shape_cast %2 : vector<1x16x128xbf16> to vector<16x128xbf16>
    %4 = tpu.concatenate %1, %3 in 1 : vector<16x256xbf16>, vector<16x128xbf16> -> vector<16x384xbf16>
    %5 = vector.extract_strided_slice %4 {offsets = [0, 0], sizes = [16, 256], strides = [1, 1]} : vector<16x384xbf16> to vector<16x256xbf16>
    %6 = vector.extract_strided_slice %4 {offsets = [0, 1], sizes = [16, 256], strides = [1, 1]} : vector<16x384xbf16> to vector<16x256xbf16>
    %7 = vector.extract_strided_slice %4 {offsets = [0, 2], sizes = [16, 256], strides = [1, 1]} : vector<16x384xbf16> to vector<16x256xbf16>
    %8 = vector.extract_strided_slice %4 {offsets = [0, 18], sizes = [16, 256], strides = [1, 1]} : vector<16x384xbf16> to vector<16x256xbf16>
    %9 = vector.extract_strided_slice %4 {offsets = [0, 19], sizes = [16, 256], strides = [1, 1]} : vector<16x384xbf16> to vector<16x256xbf16>
    %10 = vector.extract_strided_slice %4 {offsets = [0, 20], sizes = [16, 256], strides = [1, 1]} : vector<16x384xbf16> to vector<16x256xbf16>
    %11 = vector.extract_strided_slice %4 {offsets = [0, 36], sizes = [16, 256], strides = [1, 1]} : vector<16x384xbf16> to vector<16x256xbf16>
    %12 = vector.extract_strided_slice %4 {offsets = [0, 37], sizes = [16, 256], strides = [1, 1]} : vector<16x384xbf16> to vector<16x256xbf16>
    %13 = vector.extract_strided_slice %4 {offsets = [0, 38], sizes = [16, 256], strides = [1, 1]} : vector<16x384xbf16> to vector<16x256xbf16>
    %14 = tpu.concatenate %5, %6, %7, %8, %9, %10, %11, %12, %13 in 0 : vector<16x256xbf16>, vector<16x256xbf16>, vector<16x256xbf16>, vector<16x256xbf16>, vector<16x256xbf16>, vector<16x256xbf16>, vector<16x256xbf16>, vector<16x256xbf16>, vector<16x256xbf16> -> vector<144x256xbf16>
    %c0_5 = arith.constant 0 : index
    %c0_6 = arith.constant 0 : index
    %15 = vector.load %arg4[%c0_5, %c0_6] : memref<64x144xbf16, #tpu.memory_space<vmem>>, vector<64x144xbf16>
    %cst = arith.constant dense<0.000000e+00> : vector<64x256xf32>
    %16 = tpu.matmul %15, %14, %cst {dimension_numbers = #tpu.dot_dimension_numbers<[1], [0], [0], [1], [0, 0, 1, 1], [], []>} : vector<64x144xbf16>, vector<144x256xbf16>, vector<64x256xf32> -> vector<64x256xf32>
    %c0_7 = arith.constant 0 : index
    %c0_8 = arith.constant 0 : index
    %17 = vector.load %arg5[%c0_7, %c0_8] : memref<64x1xf32, #tpu.memory_space<vmem>>, vector<64x1xf32>
    %18 = vector.broadcast %17 : vector<64x1xf32> to vector<64x256xf32>
    %19 = arith.addf %16, %18 : vector<64x256xf32>
    %cst_9 = arith.constant 0.000000e+00 : f32
    %20 = vector.broadcast %cst_9 : f32 to vector<64x256xf32>
    %21 = arith.maximumf %19, %20 : vector<64x256xf32>
    %c0_10 = arith.constant 0 : index
    %c0_11 = arith.constant 0 : index
    %c0_12 = arith.constant 0 : index
    %22 = vector.load %arg6[%c0_10, %c0_11, %c0_12] : memref<1x64x256xf32, #tpu.memory_space<vmem>>, vector<1x64x256xf32>
    %23 = vector.shape_cast %22 : vector<1x64x256xf32> to vector<64x256xf32>
    %24 = vector.shape_cast %21 : vector<64x256xf32> to vector<1x64x256xf32>
    tpu.vector_store %arg6[%c0_10, %c0_11, %c0_12], %24 {strides = array<i32>} : memref<1x64x256xf32, #tpu.memory_space<vmem>>, vector<1x64x256xf32>,
    return
  }
  func.func @transform_0(%arg0: i32, %arg1: i32) -> (i32, i32, i32) {
    %c0_i32 = arith.constant 0 : i32
    %c0_i32_0 = arith.constant 0 : i32
    return %arg0, %c0_i32, %arg1 : i32, i32, i32
  }
  func.func @transform_1(%arg0: i32, %arg1: i32) -> (i32, i32, i32) {
    %c1_i32 = arith.constant 1 : i32
    %0 = arith.addi %arg1, %c1_i32 : i32
    %c2_i32 = arith.constant 2 : i32
    %1 = arith.muli %0, %c2_i32 : i32
    %c0_i32 = arith.constant 0 : i32
    %c0_i32_0 = arith.constant 0 : i32
    return %arg0, %c0_i32, %1 : i32, i32, i32
  }
  func.func @transform_2(%arg0: i32, %arg1: i32) -> (i32, i32) {
    %c0_i32 = arith.constant 0 : i32
    %c0_i32_0 = arith.constant 0 : i32
    %c0_i32_1 = arith.constant 0 : i32
    return %c0_i32, %c0_i32_0 : i32, i32
  }
  func.func @transform_3(%arg0: i32, %arg1: i32) -> (i32, i32) {
    %c0_i32 = arith.constant 0 : i32
    %c0_i32_0 = arith.constant 0 : i32
    %c0_i32_1 = arith.constant 0 : i32
    return %c0_i32, %c0_i32_0 : i32, i32
  }
  func.func @transform_4(%arg0: i32, %arg1: i32) -> (i32, i32, i32) {
    %c0_i32 = arith.constant 0 : i32
    %c0_i32_0 = arith.constant 0 : i32
    return %arg0, %c0_i32, %arg1 : i32, i32, i32
  }
}

</mosaic_0001>

<bundles_post_ra>
// kernel: late_upsampling_block.5
= control target key start
LH: loop header
LB: loop body
LE: loop exit
PB: predicated region body
PF: predicated region fallthrough
CT: control target
= control target key end

     0   :  { %s1951_s0 = inlined_call_operand.vmem [shape: bf16[2,16,640], index: 0, kind: input, shape index: {}, may-alias: {0,1}]   ;;  %s1952_s1 = inlined_call_operand.vmem [shape: bf16[2,16,640], index: 1, kind: input, shape index: {}, may-alias: {0,1}]   ;;  %s1953_s2 = inlined_call_operand.vmem [shape: bf16[16,144], index: 2, kind: input, shape index: {}]   ;;  %s1954_s3 = inlined_call_operand.vmem [shape: f32[1,512], index: 3, kind: input, shape index: {}]   ;;  %s1955_s4 = inlined_call_operand.vmem [shape: bf16[2,16,512], index: 4, kind: output, shape index: {0}]   ;;  %s1956_s5 = inlined_call_operand.vmem [shape: f32[2,2,16,2], index: 5, kind: output, shape index: {1}]  }
   0x1   :  { %1960 = sst [smem:[#allocation8_spill]] %s1955_s4 }
   0x2   :  { %s1765_s18 = smov 0   ;;  %s1767_s19 = smov 0  }
   0x3   :  { %s1769_s20 = smov 0   ;;  %s1771_s21 = smov 0  }
   0x4   :  { %s1773_s22 = smov 0   ;;  %s1775_s23 = smov 0  }
   0x5   :  { %s1777_s24 = smov 0   ;;  %s1779_s25 = smov 0  }
   0x6   :  { %s1781_s26 = smov 0  }
   0x7 LB: > { %1961 = sst [smem:[#allocation5_spill]] %s1701_s24  ;;  %s1285_s27 = sadd.s32 4294967295, %s1709_s26   ;;  %s1709_s26 = sphi %s1781_s26, %s16_s26   ;;  %s1705_s25 = sphi %s1779_s25, %s1977_s25   ;;  %s1701_s24 = sphi %s1777_s24, %s1976_s24   ;;  %s1697_s23 = sphi %s1775_s23, %s1975_s23   ;;  %s1693_s22 = sphi %s1773_s22, %s1968_s22   ;;  %s1689_s21 = sphi %s1771_s21, %s1974_s21   ;;  %s1685_s20 = sphi %s1769_s20, %s1973_s20   ;;  %s1681_s19 = sphi %s1767_s19, %s1972_s19   ;;  %s1677_s18 = sphi %s1765_s18, %s1971_s18  }
   0x8   : > { %s25_s28 = sadd.s32 1, %s1701_s24  ;;  %s28_s29 = sadd.s32 1, %s1705_s25 }
   0x9   : > { %p26_p0 = scmp.ge.s32.totalorder %s25_s28, 2  ;;  %s37_s30 = sadd.s32 1, %s1689_s21 }
   0xa   : > { %p44_p1 = scmp.ne.s32.totalorder %s1689_s21, %s1685_s20  ;;  %p45_p2 = scmp.eq.s32.totalorder %s1709_s26, 0 }
   0xb   : > { %s1979_s28 = smov (%p26_p0, %s25_s28), 0  ;;  %s1981_s29 = smov (!%p26_p0, %s28_s29), %s1705_s25 }
   0xc   : > { %1962 = sst [smem:[#allocation6_spill]] %s1979_s28  ;;  %s33_s6 = ssub.s32 %s1701_s24, %s1979_s28 }
   0xd   : > { %p30_p3 = scmp.ge.s32.totalorder %s1981_s29, 2  ;;  %s1823_s7 = sshll.u32 %s1701_s24, 1 }
   0xe   : > { %p1830_p4 = por %p45_p2, %p44_p1  ;;  %s1346_s9 = sadd.s32 2, %s1823_s7 }
   0xf   : > { %s1983_s29 = smov (%p30_p3, %s1981_s29), 0  ;;  %s1347_s10 = sshll.u32 %s1979_s28, 1 }
  0x10   : > { %1964 = sst [smem:[#allocation7_spill]] %s1983_s29  ;;  %s69_s11 = sadd.s32 1, %s1681_s19 }
  0x11   : > { %s32_s12 = ssub.s32 %s1705_s25, %s1983_s29  ;;  %s1348_s13 = sadd.s32 2, %s1347_s10 }
  0x12   : > { %s34_s14 = sor.u32 %s33_s6, %s32_s12  ;;  %s65_s15 = ssub.s32 %s1346_s9, %s1348_s13 }
  0x13   : > { %p35_p5 = scmp.eq.s32.totalorder %s34_s14, 0  ;;  %s66_s16 = sor.u32 %s65_s15, %s32_s12 }
  0x14   : > { %p67_p6 = scmp.eq.s32.totalorder %s66_s16, 0  ;;  %p76_p7 = scmp.ne.s32.totalorder %s1681_s19, %s1677_s18 }
  0x15   : > { %s1844_s17 = scalar_select %p35_p5, %s1689_s21, %s37_s30  }
  0x16   : > { %s1847_s24 = scalar_select %p67_p6, %s1681_s19, %s69_s11  }
  0x17   : > { %p1851_p8 = por %p76_p7, %p45_p2  ;;  %p155_p9 = scmp.eq.s32.totalorder %s1285_s27, 3 }
  0x18   : > { %p1290_p11 = scmp.ge.s32.totalorder %s1709_s26, 4 }
  0x19   : > { %p1858_p10 = por %p155_p9, %p44_p1 }
  0x1a   : > { %208 = sbr.rel (%p1290_p11) target bundleno = 58 (0x3a), region = 20 }
  0x21   : > { %211 = sbr.rel (!%p1830_p4) target bundleno = 50 (0x32), region = 24  ;;  %s213_s30 = sand.u32 (%p1830_p4), 1, %s1689_s21  }
  0x22   : > { %s1866_s6 = sshll.u32 (%p1830_p4), %s213_s30, 4  ;;  %s1355_s9 = smul.u32 (%p1830_p4), 10, %s1705_s25 }
  0x23   : > { %s215_s14 = scalar_lea.vmem (%p1830_p4), [#allocation2], %s1866_s6   ;;  %s1719_s28 = smov (%p1830_p4), 0  }
  0x24   : > { %s223_s27 = sadd.s32 (%p1830_p4), %s1355_s9, %s1823_s7  ;;  %s1711_s15 = smov (%p1830_p4), %s215_s14  }
  0x25   : > { %s1295_s10 = sshll.u32 (%p1830_p4), %s223_s27, 2  ;;  %s1723_s8 = smov (%p1830_p4), 0  }
  0x26   : > { %s225_s13 = scalar_lea.vmem (%p1830_p4), %s1951_s0, %s1295_s10  }
  0x27   : > { %s1715_s16 = smov (%p1830_p4), %s225_s13  }
  0x28 LB: >> { %v423_v0 = vld [vmem:[%s1717_s16] sm:$0xff]  ;;  %v425_v1 = vld [vmem:[%s1717_s16 + $0x14] sm:$0xff]  ;;  %s427_s30 = sadd.s32 1, %s1721_s28  ;;  %s417_s8 = sadd.s32 1, %s1725_s8   ;;  %s1725_s8 = sphi %s1723_s8, %s417_s8   ;;  %s1721_s28 = sphi %s1719_s28, %s1720_s28   ;;  %s1717_s16 = sphi %s1715_s16, %s432_s16   ;;  %s1713_s15 = sphi %s1711_s15, %s433_s15  }
  0x29   : >> { %424 = vst [vmem:[%s1713_s15] sm:$0xff] %v423_v0  ;;  %426 = vst [vmem:[%s1713_s15 + $0x8] sm:$0xff] %v425_v1  ;;  %p428_p12 = scmp.ge.s32.totalorder %s427_s30, 1  ;;  %p416_p13 = scmp.ge.s32.totalorder %s417_s8, 1 }
  0x2b   : >> { %s1985_s30 = smov (%p428_p12, %s427_s30), 0  ;;  %419 = sbr.rel (!%p416_p13) target bundleno = 40 (0x28), region = 268 }
  0x2c   : >> { %s1306_s9 = sshll.u32 %s1985_s30, 3  ;;  %s1720_s28 = smov %s1985_s30  }
  0x2d   : >> { %s432_s16 = scalar_lea.vmem %s225_s13, %s1306_s9   ;;  %s433_s15 = scalar_lea.vmem %s215_s14, %s1306_s9 [#allocation2]  }
  0x32 PF: > { %637 = sbr.rel (!%p1851_p8) target bundleno = 58 (0x3a), region = 90  ;;  %s639_s28 = sand.u32 (%p1851_p8), 1, %s1681_s19  }
  0x33   : > { %s1113_s6 = smul.u32 (%p1851_p8), 10, %s1705_s25  ;;  %s1318_s27 = sshll.u32 (%p1851_p8), %s639_s28, 3 }
  0x34   : > { %s641_s16 = scalar_lea.vmem (%p1851_p8), [#allocation3], %s1318_s27 }
  0x35   : > { %s1114_s10 = sadd.s32 (%p1851_p8), %s1823_s7, %s1113_s6 }
  0x36   : > { %s1320_s11 = sshll.u32 (%p1851_p8), %s1114_s10, 2 }
  0x37   : > { %s1116_s15 = scalar_lea.vmem (%p1851_p8), %s1952_s1, %s1320_s11 }
  0x38   : > { %v1321_v2 = vld [vmem:[%s1116_s15 + $0x8] sm:$0xf] (%p1851_p8)  ;;  %v1322_v3 = vld [vmem:[%s1116_s15 + $0x1c] sm:$0xf] (%p1851_p8) }
  0x39   : > { %664 = vst [vmem:[%s641_s16] sm:$0xf] %v1321_v2  ;;  %666 = vst [vmem:[%s641_s16 + $0x4] sm:$0xf] %v1322_v3 }
  0x3a PF: > { %p1323_p0 = scmp.ge.s32.totalorder %s1709_s26, 1  ;;  %p700_p1 = scmp.lt.s32.totalorder %s1709_s26, 5 }
  0x3c   : > { %p701_p2 = pnand %p1323_p0, %p700_p1 }
  0x3d   : > { %s707_s4 = sand.u32 (!%p701_p2), 1, %s1685_s20   ;;  %s714_s13 = sand.u32 (!%p701_p2), 1, %s1677_s18   ;;  %v1572_v7 = vld [vmem:[%s1953_s2 + $0x4] ss:$8 sps:$4 sm:$0xff] (!%p701_p2)   ;;  %vm898_vm0 = vcmask (!%p701_p2), 130048   ;;  %vm805_vm1 = vcmask (!%p701_p2), 1039360   ;;  %v961_v49 = vlaneseq (!%p701_p2) }
  0x3e   : > { %704 = sbr.rel (%p701_p2) target bundleno = 597 (0x255), region = 135  ;;  %s1885_s7 = sshll.u32 (!%p701_p2), %s707_s4, 4  ;;  %1336 = vmatprep.mubr.msk.bf16.mxu0 (!%p701_p2), %vm898_vm0, %v1572_v7  ;;  %vm816_vm2 = vcmask (!%p701_p2), 1031168   ;;  %vm827_vm3 = vcmask (!%p701_p2), 900096   ;;  %vm838_vm4 = vcmask (!%p701_p2), 891904   ;;  %vm849_vm5 = vcmask (!%p701_p2), 883712  }
  0x3f   : > { %s1325_s14 = sshll.u32 (!%p701_p2), %s714_s13, 3  ;;  %s709_s8 = scalar_lea.vmem (!%p701_p2), [#allocation2], %s1885_s7  ;;  %vm860_vm6 = vcmask (!%p701_p2), 752640   ;;  %vm871_vm7 = vcmask (!%p701_p2), 744448   ;;  %vm882_vm8 = vcmask (!%p701_p2), 736256   ;;  %v962_v50 = vshrl.u32 (!%p701_p2), %v961_v49, 7 }
  0x40   : > { %v1566_v4 = vld [vmem:[%s709_s8 + $0x4] ss:$8 sps:$4 sm:$0xff] (!%p701_p2)   ;;  %v1568_v5 = vld [vmem:[%s709_s8] ss:$8 sps:$4 sm:$0xff] (!%p701_p2)   ;;  %s716_s30 = scalar_lea.vmem (!%p701_p2), [#allocation3], %s1325_s14  ;;  %s1727_s28 = smov (!%p701_p2), 127  }
  0x41   : > { %801 = vrot.lane.b32.xlu0 (!%p701_p2), %v1566_v4, %s1727_s28  ;;  %v1569_v6 = vld [vmem:[%s716_s30] sm:$0xff] (!%p701_p2)   ;;  %902 = vmatprep.subr.bf16.mxu0 (!%p701_p2), %v1566_v4  ;;  %s1728_s6 = smov (!%p701_p2), 126   ;;  %s1729_s20 = smov (!%p701_p2), 110   ;;  %v963_v51 = vsub.s32 (!%p701_p2), 0, %v962_v50  ;;  %v967_v53 = vsub.s32 (!%p701_p2), 1, %v962_v50  ;;  %vm981_vm9 = vcmask (!%p701_p2), 7168  }
  0x42   : > { %799 = vrot.lane.b32.xlu1 (!%p701_p2), %v1568_v5, %s1727_s28  ;;  %903 = vmatpush1.bf16.msra.mxu0 (!%p701_p2), %v1568_v5  ;;  %s1730_s18 = smov (!%p701_p2), 109   ;;  %s1731_s27 = smov (!%p701_p2), 108   ;;  %v1570_v48 = vld [vmem:[%s1953_s2] ss:$8 sps:$4 sm:$0xff] (!%p701_p2)   ;;  %vm994_vm10 = vcmask (!%p701_p2), 15368  }
  0x43   : > { %s1732_s10 = smov (!%p701_p2), 92   ;;  %s1733_s9 = smov (!%p701_p2), 91  }
  0x44   : > { %s1734_s15 = smov (!%p701_p2), 90   ;;  %s1896_s13 = sshll.u32 (!%p701_p2), %s1693_s22, 1 }
  0x45   : > { %803 = vrot.lane.b32.xlu0 %v1569_v6, %s1727_s28  ;;  %p765_p3 = scmp.lt.s32.totalorder %s1896_s13, 3  ;;  %p770_p4 = scmp.lt.s32.totalorder %s1697_s23, 1 }
  0x46   : > { %812 = vrot.lane.b32.xlu1 %v1566_v4, %s1728_s6  ;;  %p772_p5 = scmp.lt.s32.totalorder %s1693_s22, 1  ;;  %s1967_s8 = sld [smem:[#allocation8_spill]] (%p1858_p10) }
  0x47   : > { %s766_s14 = scalar_select %p765_p3, %s1896_s13, 3 }
  0x48   : > { %s1987_s22 = smov (!%p772_p5, %s1693_s22), 1 }
  0x49   : > { %814 = vrot.lane.b32.xlu0 %v1569_v6, %s1728_s6  ;;  %s767_s28 = scalar_lea.vmem %s1954_s3, %s766_s14 }
  0x4a   : > { %810 = vrot.lane.b32.xlu1 %v1568_v5, %s1728_s6  ;;  %v959_v52 = vld [vmem:[%s767_s28] sm:$0x3]  ;;  %s1904_s6 = scalar_lea.vmem [#allocation4], %s1885_s7 }
  0x4b   : > { %v964_v54 = vrot.slane %v959_v52, %v963_v51  ;;  %v968_v55 = vrot.slane %v959_v52, %v967_v53  ;;  %s771_s7 = scalar_select %p770_p4, %s1697_s23, 1 }
  0x4d   : > { %823 = vrot.lane.b32.xlu0 %v1566_v4, %s1729_s20 }
  0x4e   : > { %825 = vrot.lane.b32.xlu1 %v1569_v6, %s1729_s20 }
  0x51   : > { %821 = vrot.lane.b32.xlu0 %v1568_v5, %s1729_s20  ;;  %s1328_s20 = sshll.u32 %s1987_s22, 1  ;;  %s1341_s22 = sshll.u32 (%p1858_p10), %s1697_s23, 3 }
  0x52   : > { %834 = vrot.lane.b32.xlu1 %v1566_v4, %s1730_s18 }
  0x55   : > { %836 = vrot.lane.b32.xlu0 %v1569_v6, %s1730_s18 }
  0x56   : > { %832 = vrot.lane.b32.xlu1 %v1568_v5, %s1730_s18  ;;  %s1329_s18 = sshll.u32 %s771_s7, 2 }
  0x59   : > { %845 = vrot.lane.b32.xlu0 %v1566_v4, %s1731_s27 }
  0x5a   : > { %847 = vrot.lane.b32.xlu1 %v1569_v6, %s1731_s27 }
  0x5d   : > { %843 = vrot.lane.b32.xlu0 %v1568_v5, %s1731_s27  ;;  %s776_s27 = sadd.s32 %s1329_s18, %s1328_s20 }
  0x5e   : > { %856 = vrot.lane.b32.xlu1 %v1566_v4, %s1732_s10 }
  0x61   : > { %858 = vrot.lane.b32.xlu0 %v1569_v6, %s1732_s10 }
  0x62   : > { %854 = vrot.lane.b32.xlu1 %v1568_v5, %s1732_s10  ;;  %s1330_s10 = sshll.u32 %s776_s27, 3 }
  0x65   : > { %867 = vrot.lane.b32.xlu0 %v1566_v4, %s1733_s9 }
  0x66   : > { %869 = vrot.lane.b32.xlu1 %v1569_v6, %s1733_s9 }
  0x69   : > { %865 = vrot.lane.b32.xlu0 %v1568_v5, %s1733_s9  ;;  %s778_s9 = scalar_lea.vmem %s1956_s5, %s1330_s10 }
  0x6a   : > { %878 = vrot.lane.b32.xlu1 %v1566_v4, %s1734_s15 }
  0x6d   : > { %880 = vrot.lane.b32.xlu0 %v1569_v6, %s1734_s15 }
  0x6e   : > { %876 = vrot.lane.b32.xlu1 %v1568_v5, %s1734_s15  ;;  %s1015_s15 = sadd.s32 (%p1858_p10), %s1341_s22, %s1896_s13 }
  0x6f   : > { %s1342_s16 = sshll.u32 (%p1858_p10), %s1015_s15, 2 }
  0x70   : > { %s1017_s30 = scalar_lea.vmem (%p1858_p10), %s1967_s8, %s1342_s16 }
  0xb3   : > { %v802_v8 = vpop.permute.xlu0 %801 }
  0xb4   : > { %v800_v9 = vpop.permute.xlu1 %799 }
  0xb5   : > { %v806_v13 = vsel %vm805_vm1, %v800_v9, %v802_v8 }
  0xb7   : > { %v804_v10 = vpop.permute.xlu0 %803 }
  0xb8   : > { %v813_v11 = vpop.permute.xlu1 %812  ;;  %v807_v12 = vsel %vm805_vm1, %v802_v8, %v804_v10 }
  0xb9   : > { %904 = vmatprep.subr.bf16.mxu0 %v807_v12 }
  0xba   : > { %905 = vmatpush1.bf16.msra.mxu0 %v806_v13 }
  0xbb   : > { %v815_v14 = vpop.permute.xlu0 %814 }
  0xbc   : > { %v811_v15 = vpop.permute.xlu1 %810  ;;  %v818_v16 = vsel %vm816_vm2, %v813_v11, %v815_v14 }
  0xbd   : > { %906 = vmatprep.subr.bf16.mxu0 %v818_v16  ;;  %v817_v17 = vsel %vm816_vm2, %v811_v15, %v813_v11 }
  0xbe   : > { %907 = vmatpush1.bf16.msra.mxu0 %v817_v17 }
  0xbf   : > { %v824_v18 = vpop.permute.xlu0 %823 }
  0xc0   : > { %v826_v19 = vpop.permute.xlu1 %825 }
  0xc1   : > { %v829_v20 = vsel %vm827_vm3, %v824_v18, %v826_v19 }
  0xc2   : > { %908 = vmatprep.subr.bf16.mxu0 %v829_v20 }
  0xc3   : > { %v822_v21 = vpop.permute.xlu0 %821 }
  0xc4   : > { %v835_v22 = vpop.permute.xlu1 %834  ;;  %v828_v23 = vsel %vm827_vm3, %v822_v21, %v824_v18 }
  0xc5   : > { %909 = vmatpush1.bf16.msra.mxu0 %v828_v23 }
  0xc7   : > { %v837_v24 = vpop.permute.xlu0 %836 }
  0xc8   : > { %v833_v25 = vpop.permute.xlu1 %832  ;;  %v840_v26 = vsel %vm838_vm4, %v835_v22, %v837_v24 }
  0xc9   : > { %910 = vmatprep.subr.bf16.mxu0 %v840_v26  ;;  %v839_v27 = vsel %vm838_vm4, %v833_v25, %v835_v22 }
  0xca   : > { %911 = vmatpush1.bf16.msra.mxu0 %v839_v27 }
  0xcb   : > { %v846_v28 = vpop.permute.xlu0 %845 }
  0xcc   : > { %v848_v29 = vpop.permute.xlu1 %847 }
  0xcd   : > { %v851_v30 = vsel %vm849_vm5, %v846_v28, %v848_v29 }
  0xce   : > { %912 = vmatprep.subr.bf16.mxu0 %v851_v30 }
  0xcf   : > { %v844_v31 = vpop.permute.xlu0 %843 }
  0xd0   : > { %v857_v32 = vpop.permute.xlu1 %856  ;;  %v850_v33 = vsel %vm849_vm5, %v844_v31, %v846_v28 }
  0xd1   : > { %913 = vmatpush1.bf16.msra.mxu0 %v850_v33 }
  0xd3   : > { %v859_v34 = vpop.permute.xlu0 %858 }
  0xd4   : > { %v855_v35 = vpop.permute.xlu1 %854  ;;  %v862_v36 = vsel %vm860_vm6, %v857_v32, %v859_v34 }
  0xd5   : > { %914 = vmatprep.subr.bf16.mxu0 %v862_v36  ;;  %v861_v37 = vsel %vm860_vm6, %v855_v35, %v857_v32 }
  0xd6   : > { %915 = vmatpush1.bf16.msra.mxu0 %v861_v37 }
  0xd7   : > { %v868_v38 = vpop.permute.xlu0 %867 }
  0xd8   : > { %v870_v39 = vpop.permute.xlu1 %869 }
  0xd9   : > { %v873_v40 = vsel %vm871_vm7, %v868_v38, %v870_v39 }
  0xda   : > { %916 = vmatprep.subr.bf16.mxu0 %v873_v40 }
  0xdb   : > { %v866_v41 = vpop.permute.xlu0 %865 }
  0xdc   : > { %v879_v42 = vpop.permute.xlu1 %878  ;;  %v872_v43 = vsel %vm871_vm7, %v866_v41, %v868_v38 }
  0xdd   : > { %917 = vmatpush1.bf16.msra.mxu0 %v872_v43 }
  0xdf   : > { %v881_v44 = vpop.permute.xlu0 %880 }
  0xe0   : > { %v877_v45 = vpop.permute.xlu1 %876  ;;  %v884_v46 = vsel %vm882_vm8, %v879_v42, %v881_v44 }
  0xe1   : > { %918 = vmatprep.subr.bf16.mxu0 %v884_v46  ;;  %v883_v47 = vsel %vm882_vm8, %v877_v45, %v879_v42 }
  0xe2   : > { %919 = vmatpush1.bf16.msra.mxu0 %v883_v47 }
  0xe5   : > { %935 = vmatmul.mubr.bf16.vlgmr.msra.gmra.mrb[0].mxu0 %v1570_v48 }
 0x1b8   : > { %v936_v56 = vpop.f32.mrb[0].mxu0 }
 0x1b9   : > { %v938_v57 = vpop.f32.mrb[1].mxu0  ;;  %v971_v58 = vmul.f32 %v964_v54, %v936_v56 }
 0x1ba   : > { %v1353_v59 = vpack.c.bf16 %v938_v57, %v936_v56  ;;  %v940_v60 = vpop.f32.mrb[2].mxu0  ;;  %v972_v61 = vmul.f32 %v968_v55, %v938_v57 }
 0x1bb   : > { %v942_v62 = vpop.f32.mrb[3].mxu0  ;;  %v973_v63 = vmul.f32 %v964_v54, %v940_v60  ;;  %v984_v0 = vmul.f32 %v971_v58, %v936_v56 }
 0x1bc   : > { %v1354_v1 = vpack.c.bf16 %v942_v62, %v940_v60  ;;  %957 = vst [vmem:[%s1904_s6] sm:$0xff] %v1353_v59  ;;  %v974_v2 = vmul.f32 %v968_v55, %v942_v62  ;;  %v975_v3 = vadd.f32 %v972_v61, %v971_v58  ;;  %v985_v4 = vmul.f32 %v972_v61, %v938_v57 }
 0x1bd   : > { %v986_v5 = vmul.f32 %v973_v63, %v940_v60 }
 0x1be   : > { %958 = vst [vmem:[%s1904_s6 + $0x8] sm:$0xff] %v1354_v1  ;;  %v987_v6 = vmul.f32 %v974_v2, %v942_v62  ;;  %976 = vadd.xlane.f32.xlu0 %v975_v3  ;;  %v978_v7 = vadd.f32 %v974_v2, %v973_v63  ;;  %v988_v8 = vadd.f32 %v985_v4, %v984_v0 }
 0x1c0   : > { %979 = vadd.xlane.f32.xlu1 %v978_v7  ;;  %v991_v9 = vadd.f32 %v987_v6, %v986_v5 }
 0x1c2   : > { %989 = vadd.xlane.f32.xlu0 %v988_v8 }
 0x1c3   : > { %v1047_v14 = vld [vmem:[%s1904_s6] sm:$0xff] (%p1858_p10) }
 0x1c4   : > { %1048 = vst [vmem:[%s1017_s30] sm:$0xff] (%p1858_p10), %v1047_v14 }
 0x1c5   : > { %v1049_v15 = vld [vmem:[%s1904_s6 + $0x8] sm:$0xff] (%p1858_p10) }
 0x1c6   : > { %992 = vadd.xlane.f32.xlu0 %v991_v9  ;;  %1050 = vst [vmem:[%s1017_s30 + $0x10] sm:$0xff] (%p1858_p10), %v1049_v15 }
 0x24b   : > { %v977_v10 = vpop.xlane.xlu0 %976 }
 0x24c   : > { %982 = vst.msk [vmem:[%s778_s9] sm:$0xff] %vm981_vm9, %v977_v10 }
 0x24d   : > { %v980_v11 = vpop.xlane.xlu1 %979 }
 0x24e   : > { %983 = vst.msk [vmem:[%s778_s9 + $0x8] sm:$0xff] %vm981_vm9, %v980_v11  ;;  %1012 = sbr.rel (!%p1858_p10) target bundleno = 597 (0x255), region = 147 }
 0x24f   : > { %v990_v12 = vpop.xlane.xlu0 %989 }
 0x250   : > { %995 = vst.msk [vmem:[%s778_s9] sm:$0xff] %vm994_vm10, %v990_v12 }
 0x253   : > { %v993_v13 = vpop.xlane.xlu0 %992 }
 0x254   : > { %996 = vst.msk [vmem:[%s778_s9 + $0x8] sm:$0xff] %vm994_vm10, %v993_v13 }
 0x255 PF: > { %s16_s26 = sadd.s32 1, %s1709_s26   ;;  %s1968_s22 = sld [smem:[#allocation5_spill]] }
 0x256   : > { %p13_p6 = scmp.ge.s32.totalorder %s16_s26, 6   ;;  %s1969_s29 = sld [smem:[#allocation6_spill]] }
 0x257   : > { %s1970_s13 = sld [smem:[#allocation7_spill]]  ;;  %s1971_s18 = smov %s1681_s19 }
 0x258   : > { %s1972_s19 = smov %s1847_s24  ;;  %s1973_s20 = smov %s1689_s21 }
 0x259   : > { %s1974_s21 = smov %s1844_s17  ;;  %s1975_s23 = smov %s1705_s25 }
 0x25a   :  { %15 = sbr.rel (!%p13_p6) target bundleno = 7 (0x7), region = 301 }
 0x25c   : > { %s1976_s24 = smov %s1969_s29 }
 0x25d   : > { %s1977_s25 = smov %s1970_s13 }

// kernel: late_upsampling_block.9
= control target key start
LH: loop header
LB: loop body
LE: loop exit
PB: predicated region body
PF: predicated region fallthrough
CT: control target
= control target key end

     0   :  { %s1772_s15 = smov 0   ;;  %s1774_s16 = smov 0   ;;  %s2017_s0 = inlined_call_operand.vmem [shape: bf16[2,16,640], index: 0, kind: input, shape index: {}, may-alias: {0,1}]   ;;  %s2018_s1 = inlined_call_operand.vmem [shape: bf16[2,16,640], index: 1, kind: input, shape index: {}, may-alias: {0,1}]   ;;  %s2019_s2 = inlined_call_operand.vmem [shape: bf16[64,144], index: 2, kind: input, shape index: {}]   ;;  %s2020_s3 = inlined_call_operand.vmem [shape: f32[64,1], index: 3, kind: input, shape index: {}]   ;;  %s2021_s4 = inlined_call_operand.vmem [shape: f32[2,64,512], index: 4, kind: output, shape index: {}]  }
   0x1   :  { %s1776_s17 = smov 0   ;;  %s1778_s18 = smov 0  }
   0x2   :  { %s1780_s19 = smov 0   ;;  %s1782_s20 = smov 0  }
   0x3   :  { %s1784_s21 = smov 0   ;;  %s1786_s22 = smov 0  }
   0x4   :  { %s1788_s23 = smov 0  }
   0x5 LB: > { %2025 = sst [smem:[#allocation5_spill]] %s1712_s21  ;;  %s1265_s24 = sadd.s32 4294967295, %s1720_s23   ;;  %s1720_s23 = sphi %s1788_s23, %s14_s23   ;;  %s1716_s22 = sphi %s1786_s22, %s2039_s22   ;;  %s1712_s21 = sphi %s1784_s21, %s2032_s21   ;;  %s1708_s20 = sphi %s1782_s20, %s2038_s20   ;;  %s1704_s19 = sphi %s1780_s19, %s2031_s19   ;;  %s1700_s18 = sphi %s1778_s18, %s2037_s18   ;;  %s1696_s17 = sphi %s1776_s17, %s2036_s17   ;;  %s1692_s16 = sphi %s1774_s16, %s2035_s16   ;;  %s1688_s15 = sphi %s1772_s15, %s2034_s15  }
   0x6   : > { %s23_s25 = sadd.s32 1, %s1712_s21  ;;  %s26_s26 = sadd.s32 1, %s1716_s22 }
   0x7   : > { %p24_p0 = scmp.ge.s32.totalorder %s23_s25, 2  ;;  %s35_s27 = sadd.s32 1, %s1700_s18 }
   0x8   : > { %p42_p1 = scmp.ne.s32.totalorder %s1700_s18, %s1696_s17  ;;  %p43_p2 = scmp.eq.s32.totalorder %s1720_s23, 0 }
   0x9   : > { %s2041_s25 = smov (%p24_p0, %s23_s25), 0  ;;  %s2043_s26 = smov (!%p24_p0, %s26_s26), %s1716_s22 }
   0xa   : > { %2026 = sst [smem:[#allocation6_spill]] %s2041_s25  ;;  %s31_s28 = ssub.s32 %s1712_s21, %s2041_s25 }
   0xb   : > { %p28_p3 = scmp.ge.s32.totalorder %s2043_s26, 2  ;;  %s1830_s29 = sshll.u32 %s1712_s21, 1 }
   0xc   : > { %p1837_p4 = por %p43_p2, %p42_p1  ;;  %s1329_s5 = sadd.s32 2, %s1830_s29 }
   0xd   : > { %s2045_s26 = smov (%p28_p3, %s2043_s26), 0  ;;  %s1330_s6 = sshll.u32 %s2041_s25, 1 }
   0xe   : > { %2028 = sst [smem:[#allocation7_spill]] %s2045_s26  ;;  %s67_s7 = sadd.s32 1, %s1692_s16 }
   0xf   : > { %s30_s8 = ssub.s32 %s1716_s22, %s2045_s26  ;;  %s1331_s9 = sadd.s32 2, %s1330_s6 }
  0x10   : > { %s32_s10 = sor.u32 %s31_s28, %s30_s8  ;;  %s63_s11 = ssub.s32 %s1329_s5, %s1331_s9 }
  0x11   : > { %p33_p5 = scmp.eq.s32.totalorder %s32_s10, 0  ;;  %s64_s12 = sor.u32 %s63_s11, %s30_s8 }
  0x12   : > { %p65_p6 = scmp.eq.s32.totalorder %s64_s12, 0  ;;  %p74_p7 = scmp.ne.s32.totalorder %s1692_s16, %s1688_s15 }
  0x13   : > { %s1851_s13 = scalar_select %p33_p5, %s1700_s18, %s35_s27  }
  0x14   : > { %s1854_s14 = scalar_select %p65_p6, %s1692_s16, %s67_s7  }
  0x15   : > { %p1858_p8 = por %p74_p7, %p43_p2  ;;  %p148_p9 = scmp.eq.s32.totalorder %s1265_s24, 3 }
  0x16   : > { %p1270_p11 = scmp.ge.s32.totalorder %s1720_s23, 4 }
  0x17   : > { %p1865_p10 = por %p148_p9, %p42_p1 }
  0x18   : > { %176 = sbr.rel (%p1270_p11) target bundleno = 56 (0x38), region = 24 }
  0x1f   : > { %179 = sbr.rel (!%p1837_p4) target bundleno = 48 (0x30), region = 28  ;;  %s181_s27 = sand.u32 (%p1837_p4), 1, %s1700_s18  }
  0x20   : > { %s1873_s28 = sshll.u32 (%p1837_p4), %s181_s27, 4  ;;  %s1354_s5 = smul.u32 (%p1837_p4), 10, %s1716_s22 }
  0x21   : > { %s183_s10 = scalar_lea.vmem (%p1837_p4), [#allocation2], %s1873_s28   ;;  %s1730_s25 = smov (%p1837_p4), 0  }
  0x22   : > { %s191_s24 = sadd.s32 (%p1837_p4), %s1354_s5, %s1830_s29  ;;  %s1722_s11 = smov (%p1837_p4), %s183_s10  }
  0x23   : > { %s1275_s6 = sshll.u32 (%p1837_p4), %s191_s24, 2  ;;  %s1734_s30 = smov (%p1837_p4), 0  }
  0x24   : > { %s193_s9 = scalar_lea.vmem (%p1837_p4), %s2017_s0, %s1275_s6  }
  0x25   : > { %s1726_s12 = smov (%p1837_p4), %s193_s9  }
  0x26 LB: >> { %v391_v0 = vld [vmem:[%s1728_s12] sm:$0xff]  ;;  %v393_v1 = vld [vmem:[%s1728_s12 + $0x14] sm:$0xff]  ;;  %s395_s27 = sadd.s32 1, %s1732_s25  ;;  %s385_s30 = sadd.s32 1, %s1736_s30   ;;  %s1736_s30 = sphi %s1734_s30, %s385_s30   ;;  %s1732_s25 = sphi %s1730_s25, %s1731_s25   ;;  %s1728_s12 = sphi %s1726_s12, %s400_s12   ;;  %s1724_s11 = sphi %s1722_s11, %s401_s11  }
  0x27   : >> { %392 = vst [vmem:[%s1724_s11] sm:$0xff] %v391_v0  ;;  %394 = vst [vmem:[%s1724_s11 + $0x8] sm:$0xff] %v393_v1  ;;  %p396_p12 = scmp.ge.s32.totalorder %s395_s27, 1  ;;  %p384_p13 = scmp.ge.s32.totalorder %s385_s30, 1 }
  0x29   : >> { %s2047_s27 = smov (%p396_p12, %s395_s27), 0  ;;  %387 = sbr.rel (!%p384_p13) target bundleno = 38 (0x26), region = 238 }
  0x2a   : >> { %s1286_s5 = sshll.u32 %s2047_s27, 3  ;;  %s1731_s25 = smov %s2047_s27  }
  0x2b   : >> { %s400_s12 = scalar_lea.vmem %s193_s9, %s1286_s5   ;;  %s401_s11 = scalar_lea.vmem %s183_s10, %s1286_s5 [#allocation2]  }
  0x30 PF: > { %605 = sbr.rel (!%p1858_p8) target bundleno = 56 (0x38), region = 94  ;;  %s607_s25 = sand.u32 (%p1858_p8), 1, %s1692_s16  }
  0x31   : > { %s1131_s28 = smul.u32 (%p1858_p8), 10, %s1716_s22  ;;  %s1298_s24 = sshll.u32 (%p1858_p8), %s607_s25, 3 }
  0x32   : > { %s609_s12 = scalar_lea.vmem (%p1858_p8), [#allocation3], %s1298_s24 }
  0x33   : > { %s1132_s6 = sadd.s32 (%p1858_p8), %s1830_s29, %s1131_s28 }
  0x34   : > { %s1300_s7 = sshll.u32 (%p1858_p8), %s1132_s6, 2 }
  0x35   : > { %s1134_s11 = scalar_lea.vmem (%p1858_p8), %s2018_s1, %s1300_s7 }
  0x36   : > { %v1301_v2 = vld [vmem:[%s1134_s11 + $0x8] sm:$0xf] (%p1858_p8)  ;;  %v1302_v3 = vld [vmem:[%s1134_s11 + $0x1c] sm:$0xf] (%p1858_p8) }
  0x37   : > { %632 = vst [vmem:[%s609_s12] sm:$0xf] %v1301_v2  ;;  %634 = vst [vmem:[%s609_s12 + $0x4] sm:$0xf] %v1302_v3 }
  0x38 PF: > { %p1303_p0 = scmp.ge.s32.totalorder %s1720_s23, 1  ;;  %p660_p1 = scmp.lt.s32.totalorder %s1720_s23, 5 }
  0x3a   : > { %p661_p2 = pnand %p1303_p0, %p660_p1 }
  0x3b   : > { %s667_s21 = sand.u32 (!%p661_p2), 1, %s1696_s17   ;;  %s674_s10 = sand.u32 (!%p661_p2), 1, %s1688_s15   ;;  %v1574_v7 = vld [vmem:[%s2019_s2 + $0x4] ss:$8 sps:$4 sm:$0xff] (!%p661_p2)   ;;  %vm910_vm0 = vcmask (!%p661_p2), 130048   ;;  %v1746_v9 = vmov (!%p661_p2), 0  }
  0x3c   : > { %664 = sbr.rel (%p661_p2) target bundleno = 464 (0x1d0), region = 135  ;;  %s1304_s29 = sshll.u32 (!%p661_p2), %s667_s21, 4  ;;  %v1577_v8 = vld [vmem:[%s2019_s2 + $0x24] ss:$8 sps:$4 sm:$0xff] (!%p661_p2)   ;;  %1318 = vmatprep.mubr.msk.bf16.mxu0 (!%p661_p2), %vm910_vm0, %v1574_v7  ;;  %1566 = vset.pattern.permute.xlu0 (!%p661_p2), %v1746_v9  ;;  %v829_v12 = vld [vmem:[%s2020_s3 + $0x18] sm:$0xff] (!%p661_p2)  ;;  %v828_v13 = vld [vmem:[%s2020_s3 + $0x10] sm:$0xff] (!%p661_p2) }
  0x3d   : > { %s669_s9 = scalar_lea.vmem (!%p661_p2), [#allocation2], %s1304_s29  ;;  %s1305_s30 = sshll.u32 (!%p661_p2), %s674_s10, 3  ;;  %1320 = vmatprep.mubr.msk.bf16.mxu1 (!%p661_p2), %vm910_vm0, %v1577_v8  ;;  %v826_v10 = vld [vmem:[%s2020_s3] sm:$0xff] (!%p661_p2)  ;;  %1567 = vset.pattern.permute.xlu1 (!%p661_p2), %v1746_v9  ;;  %v827_v11 = vld [vmem:[%s2020_s3 + $0x8] sm:$0xff] (!%p661_p2)  ;;  %v833_v16 = vld [vmem:[%s2020_s3 + $0x38] sm:$0xff] (!%p661_p2)  ;;  %vm736_vm1 = vcmask (!%p661_p2), 1039360  }
  0x3e   : > { %v1568_v4 = vld [vmem:[%s669_s9 + $0x4] ss:$8 sps:$4 sm:$0xff] (!%p661_p2)   ;;  %v1570_v5 = vld [vmem:[%s669_s9] ss:$8 sps:$4 sm:$0xff] (!%p661_p2)   ;;  %s1738_s27 = smov (!%p661_p2), 127   ;;  %s676_s25 = scalar_lea.vmem (!%p661_p2), [#allocation3], %s1305_s30 }
  0x3f   : > { %732 = vrot.lane.b32.xlu0 (!%p661_p2), %v1568_v4, %s1738_s27  ;;  %923 = vmatprep.subr.bf16.mxu0 (!%p661_p2), %v1568_v4  ;;  %v1571_v6 = vld [vmem:[%s676_s25] sm:$0xff] (!%p661_p2)   ;;  %s1739_s28 = smov (!%p661_p2), 126   ;;  %s1740_s24 = smov (!%p661_p2), 110   ;;  %v832_v17 = vld [vmem:[%s2020_s3 + $0x30] sm:$0xff] (!%p661_p2)  ;;  %vm747_vm2 = vcmask (!%p661_p2), 1031168   ;;  %vm758_vm3 = vcmask (!%p661_p2), 900096  }
  0x40   : > { %730 = vrot.lane.b32.xlu1 (!%p661_p2), %v1570_v5, %s1738_s27  ;;  %1336 = vmatprep.subr.bf16.mxu1 (!%p661_p2), %v1568_v4  ;;  %s1741_s15 = smov (!%p661_p2), 109   ;;  %s1742_s6 = smov (!%p661_p2), 108   ;;  %v831_v14 = vld [vmem:[%s2020_s3 + $0x28] sm:$0xff] (!%p661_p2)  ;;  %v830_v15 = vld [vmem:[%s2020_s3 + $0x20] sm:$0xff] (!%p661_p2)  ;;  %vm769_vm4 = vcmask (!%p661_p2), 891904   ;;  %vm780_vm5 = vcmask (!%p661_p2), 883712  }
  0x41   : > { %924 = vmatpush1.bf16.msra.mxu0 (!%p661_p2), %v1570_v5  ;;  %1345 = vmatpush1.bf16.msra.mxu1 (!%p661_p2), %v1570_v5  ;;  %s1743_s7 = smov (!%p661_p2), 92   ;;  %s1744_s29 = smov (!%p661_p2), 91   ;;  %vm791_vm6 = vcmask (!%p661_p2), 752640   ;;  %vm802_vm7 = vcmask (!%p661_p2), 744448   ;;  %vm813_vm8 = vcmask (!%p661_p2), 736256  }
  0x42   : > { %s1745_s9 = smov (!%p661_p2), 90   ;;  %v1572_v58 = vld [vmem:[%s2019_s2] ss:$8 sps:$4 sm:$0xff] (!%p661_p2)   ;;  %v1578_v60 = vld [vmem:[%s2019_s2 + $0x14] ss:$8 sps:$4 sm:$0xff] (!%p661_p2)  }
  0x43   : > { %734 = vrot.lane.b32.xlu0 %v1571_v6, %s1738_s27  ;;  %v1575_v59 = vld [vmem:[%s2019_s2 + $0x20] ss:$8 sps:$4 sm:$0xff]   ;;  %v1580_v61 = vld [vmem:[%s2019_s2 + $0x34] ss:$8 sps:$4 sm:$0xff]   ;;  %v1582_v62 = vld [vmem:[%s2019_s2 + $0x10] ss:$8 sps:$4 sm:$0xff]  }
  0x44   : > { %743 = vrot.lane.b32.xlu1 %v1568_v4, %s1739_s28  ;;  %v1583_v63 = vld [vmem:[%s2019_s2 + $0x30] ss:$8 sps:$4 sm:$0xff]  }
  0x47   : > { %745 = vrot.lane.b32.xlu0 %v1571_v6, %s1739_s28 }
  0x48   : > { %741 = vrot.lane.b32.xlu1 %v1570_v5, %s1739_s28 }
  0x4b   : > { %754 = vrot.lane.b32.xlu0 %v1568_v4, %s1740_s24 }
  0x4c   : > { %756 = vrot.lane.b32.xlu1 %v1571_v6, %s1740_s24 }
  0x4f   : > { %752 = vrot.lane.b32.xlu0 %v1570_v5, %s1740_s24 }
  0x50   : > { %765 = vrot.lane.b32.xlu1 %v1568_v4, %s1741_s15 }
  0x53   : > { %767 = vrot.lane.b32.xlu0 %v1571_v6, %s1741_s15 }
  0x54   : > { %763 = vrot.lane.b32.xlu1 %v1570_v5, %s1741_s15 }
  0x57   : > { %776 = vrot.lane.b32.xlu0 %v1568_v4, %s1742_s6 }
  0x58   : > { %778 = vrot.lane.b32.xlu1 %v1571_v6, %s1742_s6 }
  0x5b   : > { %774 = vrot.lane.b32.xlu0 %v1570_v5, %s1742_s6 }
  0x5c   : > { %787 = vrot.lane.b32.xlu1 %v1568_v4, %s1743_s7 }
  0x5f   : > { %789 = vrot.lane.b32.xlu0 %v1571_v6, %s1743_s7 }
  0x60   : > { %785 = vrot.lane.b32.xlu1 %v1570_v5, %s1743_s7 }
  0x63   : > { %798 = vrot.lane.b32.xlu0 %v1568_v4, %s1744_s29 }
  0x64   : > { %800 = vrot.lane.b32.xlu1 %v1571_v6, %s1744_s29 }
  0x67   : > { %796 = vrot.lane.b32.xlu0 %v1570_v5, %s1744_s29  ;;  %s1306_s29 = sshll.u32 %s667_s21, 7  ;;  %s1323_s21 = sshll.u32 (%p1865_p10), %s1704_s19, 1 }
  0x68   : > { %809 = vrot.lane.b32.xlu1 %v1568_v4, %s1745_s9  ;;  %s1949_s17 = scalar_lea.vmem [#allocation4], %s1306_s29 }
  0x6b   : > { %811 = vrot.lane.b32.xlu0 %v1571_v6, %s1745_s9 }
  0x6c   : > { %807 = vrot.lane.b32.xlu1 %v1570_v5, %s1745_s9  ;;  %s1324_s9 = sshll.u32 (%p1865_p10), %s1708_s20, 5 }
  0x6d   : > { %s1037_s26 = sadd.s32 (%p1865_p10), %s1324_s9, %s1323_s21 }
  0x6e   : > { %s1325_s10 = sshll.u32 (%p1865_p10), %s1037_s26, 3 }
  0x6f   : > { %836 = vperm.xlu0 %1566, %v826_v10   ;;  %s1039_s25 = scalar_lea.vmem (%p1865_p10), %s2021_s4, %s1325_s10 }
  0x70   : > { %841 = vperm.xlu1 %1567, %v827_v11  }
  0x73   : > { %851 = vperm.xlu0 %1566, %v829_v12  }
  0x74   : > { %846 = vperm.xlu1 %1567, %v828_v13  }
  0x77   : > { %861 = vperm.xlu0 %1566, %v831_v14  }
  0x78   : > { %856 = vperm.xlu1 %1567, %v830_v15  }
  0x7b   : > { %871 = vperm.xlu0 %1566, %v833_v16  }
  0x7c   : > { %866 = vperm.xlu1 %1567, %v832_v17  }
  0xb1   : > { %v733_v18 = vpop.permute.xlu0 %732 }
  0xb2   : > { %v731_v19 = vpop.permute.xlu1 %730 }
  0xb3   : > { %v737_v23 = vsel %vm736_vm1, %v731_v19, %v733_v18 }
  0xb5   : > { %v735_v20 = vpop.permute.xlu0 %734 }
  0xb6   : > { %v744_v21 = vpop.permute.xlu1 %743  ;;  %v738_v22 = vsel %vm736_vm1, %v733_v18, %v735_v20 }
  0xb7   : > { %925 = vmatprep.subr.bf16.mxu0 %v738_v22  ;;  %1337 = vmatprep.subr.bf16.mxu1 %v738_v22 }
  0xb8   : > { %926 = vmatpush1.bf16.msra.mxu0 %v737_v23  ;;  %1346 = vmatpush1.bf16.msra.mxu1 %v737_v23 }
  0xb9   : > { %v746_v24 = vpop.permute.xlu0 %745 }
  0xba   : > { %v742_v25 = vpop.permute.xlu1 %741  ;;  %v749_v26 = vsel %vm747_vm2, %v744_v21, %v746_v24 }
  0xbb   : > { %927 = vmatprep.subr.bf16.mxu0 %v749_v26  ;;  %1338 = vmatprep.subr.bf16.mxu1 %v749_v26  ;;  %v748_v27 = vsel %vm747_vm2, %v742_v25, %v744_v21 }
  0xbc   : > { %928 = vmatpush1.bf16.msra.mxu0 %v748_v27  ;;  %1347 = vmatpush1.bf16.msra.mxu1 %v748_v27 }
  0xbd   : > { %v755_v28 = vpop.permute.xlu0 %754 }
  0xbe   : > { %v757_v29 = vpop.permute.xlu1 %756 }
  0xbf   : > { %v760_v30 = vsel %vm758_vm3, %v755_v28, %v757_v29 }
  0xc0   : > { %929 = vmatprep.subr.bf16.mxu0 %v760_v30  ;;  %1339 = vmatprep.subr.bf16.mxu1 %v760_v30 }
  0xc1   : > { %v753_v31 = vpop.permute.xlu0 %752 }
  0xc2   : > { %v766_v32 = vpop.permute.xlu1 %765  ;;  %v759_v33 = vsel %vm758_vm3, %v753_v31, %v755_v28 }
  0xc3   : > { %930 = vmatpush1.bf16.msra.mxu0 %v759_v33  ;;  %1348 = vmatpush1.bf16.msra.mxu1 %v759_v33 }
  0xc5   : > { %v768_v34 = vpop.permute.xlu0 %767 }
  0xc6   : > { %v764_v35 = vpop.permute.xlu1 %763  ;;  %v771_v36 = vsel %vm769_vm4, %v766_v32, %v768_v34 }
  0xc7   : > { %931 = vmatprep.subr.bf16.mxu0 %v771_v36  ;;  %1340 = vmatprep.subr.bf16.mxu1 %v771_v36  ;;  %v770_v37 = vsel %vm769_vm4, %v764_v35, %v766_v32 }
  0xc8   : > { %932 = vmatpush1.bf16.msra.mxu0 %v770_v37  ;;  %1349 = vmatpush1.bf16.msra.mxu1 %v770_v37 }
  0xc9   : > { %v777_v38 = vpop.permute.xlu0 %776 }
  0xca   : > { %v779_v39 = vpop.permute.xlu1 %778 }
  0xcb   : > { %v782_v40 = vsel %vm780_vm5, %v777_v38, %v779_v39 }
  0xcc   : > { %933 = vmatprep.subr.bf16.mxu0 %v782_v40  ;;  %1341 = vmatprep.subr.bf16.mxu1 %v782_v40 }
  0xcd   : > { %v775_v41 = vpop.permute.xlu0 %774 }
  0xce   : > { %v788_v42 = vpop.permute.xlu1 %787  ;;  %v781_v43 = vsel %vm780_vm5, %v775_v41, %v777_v38 }
  0xcf   : > { %934 = vmatpush1.bf16.msra.mxu0 %v781_v43  ;;  %1350 = vmatpush1.bf16.msra.mxu1 %v781_v43 }
  0xd1   : > { %v790_v44 = vpop.permute.xlu0 %789 }
  0xd2   : > { %v786_v45 = vpop.permute.xlu1 %785  ;;  %v793_v46 = vsel %vm791_vm6, %v788_v42, %v790_v44 }
  0xd3   : > { %935 = vmatprep.subr.bf16.mxu0 %v793_v46  ;;  %1342 = vmatprep.subr.bf16.mxu1 %v793_v46  ;;  %v792_v47 = vsel %vm791_vm6, %v786_v45, %v788_v42 }
  0xd4   : > { %936 = vmatpush1.bf16.msra.mxu0 %v792_v47  ;;  %1351 = vmatpush1.bf16.msra.mxu1 %v792_v47 }
  0xd5   : > { %v799_v48 = vpop.permute.xlu0 %798 }
  0xd6   : > { %v801_v49 = vpop.permute.xlu1 %800 }
  0xd7   : > { %v804_v50 = vsel %vm802_vm7, %v799_v48, %v801_v49 }
  0xd8   : > { %937 = vmatprep.subr.bf16.mxu0 %v804_v50  ;;  %1343 = vmatprep.subr.bf16.mxu1 %v804_v50 }
  0xd9   : > { %v797_v51 = vpop.permute.xlu0 %796 }
  0xda   : > { %v810_v52 = vpop.permute.xlu1 %809  ;;  %v803_v53 = vsel %vm802_vm7, %v797_v51, %v799_v48 }
  0xdb   : > { %938 = vmatpush1.bf16.msra.mxu0 %v803_v53  ;;  %1352 = vmatpush1.bf16.msra.mxu1 %v803_v53 }
  0xdd   : > { %v812_v54 = vpop.permute.xlu0 %811 }
  0xde   : > { %v808_v55 = vpop.permute.xlu1 %807  ;;  %v815_v56 = vsel %vm813_vm8, %v810_v52, %v812_v54 }
  0xdf   : > { %939 = vmatprep.subr.bf16.mxu0 %v815_v56  ;;  %1344 = vmatprep.subr.bf16.mxu1 %v815_v56  ;;  %v814_v57 = vsel %vm813_vm8, %v808_v55, %v810_v52 }
  0xe0   : > { %940 = vmatpush1.bf16.msra.mxu0 %v814_v57  ;;  %1353 = vmatpush1.bf16.msra.mxu1 %v814_v57 }
  0xe3   : > { %956 = vmatmul.mubr.bf16.vlgmr.msra.gmra.mrb[0].mxu0 %v1572_v58  ;;  %976 = vmatmul.mubr.bf16.vlgmr.msra.gmra.mrb[0].mxu1 %v1575_v59 }
  0xe4   : > { %1319 = vmatprep.mubr.msk.bf16.mxu0 %vm910_vm0, %v1578_v60  ;;  %1321 = vmatprep.mubr.msk.bf16.mxu1 %vm910_vm0, %v1580_v61 }
  0xeb   : > { %966 = vmatmul.mubr.bf16.gmra.mrb[4].mxu0 %v1582_v62  ;;  %986 = vmatmul.mubr.bf16.gmra.mrb[4].mxu1 %v1583_v63 }
  0xee   : > { %v837_v0 = vpop.permute.xlu0 %836 }
  0xef   : > { %v842_v1 = vpop.permute.xlu1 %841 }
  0xf2   : > { %v852_v2 = vpop.permute.xlu0 %851 }
  0xf3   : > { %v847_v3 = vpop.permute.xlu1 %846 }
  0xf6   : > { %v862_v4 = vpop.permute.xlu0 %861 }
  0xf7   : > { %v857_v5 = vpop.permute.xlu1 %856 }
  0xfa   : > { %v872_v30 = vpop.permute.xlu0 %871 }
  0xfb   : > { %v867_v31 = vpop.permute.xlu1 %866 }
 0x1b6   : > { %v957_v6 = vpop.f32.mrb[0].mxu0  ;;  %v977_v7 = vpop.f32.mrb[0].mxu1 }
 0x1b7   : > { %v958_v8 = vadd.f32 %v957_v6, %v837_v0  ;;  %v978_v9 = vadd.f32 %v977_v7, %v857_v5  ;;  %v959_v10 = vpop.f32.mrb[1].mxu0  ;;  %v979_v11 = vpop.f32.mrb[1].mxu1 }
 0x1b8   : > { %v960_v12 = vadd.f32 %v959_v10, %v837_v0  ;;  %v980_v13 = vadd.f32 %v979_v11, %v857_v5  ;;  %v961_v14 = vpop.f32.mrb[2].mxu0  ;;  %v981_v15 = vpop.f32.mrb[2].mxu1 }
 0x1b9   : > { %v996_v16 = vmax.f32 %v958_v8, 0.0  ;;  %v1004_v17 = vmax.f32 %v978_v9, 0.0  ;;  %v962_v18 = vadd.f32 %v961_v14, %v842_v1  ;;  %v982_v19 = vadd.f32 %v981_v15, %v862_v4  ;;  %v963_v20 = vpop.f32.mrb[3].mxu0  ;;  %v983_v21 = vpop.f32.mrb[3].mxu1 }
 0x1ba   : > { %v997_v22 = vmax.f32 %v960_v12, 0.0  ;;  %v1005_v23 = vmax.f32 %v980_v13, 0.0  ;;  %v964_v24 = vadd.f32 %v963_v20, %v842_v1  ;;  %v984_v25 = vadd.f32 %v983_v21, %v862_v4 }
 0x1bb   : > { %1012 = vst [vmem:[%s1949_s17] sm:$0xff] %v996_v16  ;;  %1020 = vst [vmem:[%s1949_s17 + $0x40] sm:$0xff] %v1004_v17  ;;  %v998_v26 = vmax.f32 %v962_v18, 0.0  ;;  %v1006_v27 = vmax.f32 %v982_v19, 0.0 }
 0x1bc   : > { %1013 = vst [vmem:[%s1949_s17 + $0x8] sm:$0xff] %v997_v22  ;;  %1021 = vst [vmem:[%s1949_s17 + $0x48] sm:$0xff] %v1005_v23  ;;  %v999_v28 = vmax.f32 %v964_v24, 0.0  ;;  %v1007_v29 = vmax.f32 %v984_v25, 0.0 }
 0x1bd   : > { %1014 = vst [vmem:[%s1949_s17 + $0x10] sm:$0xff] %v998_v26  ;;  %1022 = vst [vmem:[%s1949_s17 + $0x50] sm:$0xff] %v1006_v27 }
 0x1be   : > { %1015 = vst [vmem:[%s1949_s17 + $0x18] sm:$0xff] %v999_v28  ;;  %1023 = vst [vmem:[%s1949_s17 + $0x58] sm:$0xff] %v1007_v29  ;;  %v967_v32 = vpop.f32.mrb[4].mxu0  ;;  %v987_v33 = vpop.f32.mrb[4].mxu1 }
 0x1bf   : > { %v968_v34 = vadd.f32 %v967_v32, %v847_v3  ;;  %v988_v35 = vadd.f32 %v987_v33, %v867_v31  ;;  %v969_v36 = vpop.f32.mrb[5].mxu0  ;;  %v989_v37 = vpop.f32.mrb[5].mxu1 }
 0x1c0   : > { %v970_v38 = vadd.f32 %v969_v36, %v847_v3  ;;  %v990_v39 = vadd.f32 %v989_v37, %v867_v31  ;;  %v971_v40 = vpop.f32.mrb[6].mxu0  ;;  %v991_v41 = vpop.f32.mrb[6].mxu1  ;;  %1034 = sbr.rel (!%p1865_p10) target bundleno = 464 (0x1d0), region = 147 }
 0x1c1   : > { %v1000_v42 = vmax.f32 %v968_v34, 0.0  ;;  %v1008_v43 = vmax.f32 %v988_v35, 0.0  ;;  %v972_v44 = vadd.f32 %v971_v40, %v852_v2  ;;  %v992_v45 = vadd.f32 %v991_v41, %v872_v30  ;;  %v973_v46 = vpop.f32.mrb[7].mxu0  ;;  %v993_v47 = vpop.f32.mrb[7].mxu1 }
 0x1c2   : > { %v1001_v48 = vmax.f32 %v970_v38, 0.0  ;;  %v1009_v49 = vmax.f32 %v990_v39, 0.0  ;;  %v974_v50 = vadd.f32 %v973_v46, %v852_v2  ;;  %v994_v51 = vadd.f32 %v993_v47, %v872_v30  ;;  %v1052_v56 = vld [vmem:[%s1949_s17] sm:$0xff] (%p1865_p10) }
 0x1c3   : > { %1016 = vst [vmem:[%s1949_s17 + $0x20] sm:$0xff] %v1000_v42  ;;  %1024 = vst [vmem:[%s1949_s17 + $0x60] sm:$0xff] %v1008_v43  ;;  %v1002_v52 = vmax.f32 %v972_v44, 0.0  ;;  %v1010_v53 = vmax.f32 %v992_v45, 0.0  ;;  %v1054_v57 = vld [vmem:[%s1949_s17 + $0x8] sm:$0xff] (%p1865_p10)  ;;  %v1068_v0 = vld [vmem:[%s1949_s17 + $0x40] sm:$0xff] (%p1865_p10) }
 0x1c4   : > { %1017 = vst [vmem:[%s1949_s17 + $0x28] sm:$0xff] %v1001_v48  ;;  %1025 = vst [vmem:[%s1949_s17 + $0x68] sm:$0xff] %v1009_v49  ;;  %v1003_v54 = vmax.f32 %v974_v50, 0.0  ;;  %v1011_v55 = vmax.f32 %v994_v51, 0.0  ;;  %v1056_v58 = vld [vmem:[%s1949_s17 + $0x10] sm:$0xff] (%p1865_p10)  ;;  %v1070_v1 = vld [vmem:[%s1949_s17 + $0x48] sm:$0xff] (%p1865_p10) }
 0x1c5   : > { %1018 = vst [vmem:[%s1949_s17 + $0x30] sm:$0xff] %v1002_v52  ;;  %1026 = vst [vmem:[%s1949_s17 + $0x70] sm:$0xff] %v1010_v53  ;;  %v1058_v59 = vld [vmem:[%s1949_s17 + $0x18] sm:$0xff] (%p1865_p10)  ;;  %v1072_v2 = vld [vmem:[%s1949_s17 + $0x50] sm:$0xff] (%p1865_p10) }
 0x1c6   : > { %1019 = vst [vmem:[%s1949_s17 + $0x38] sm:$0xff] %v1003_v54  ;;  %1027 = vst [vmem:[%s1949_s17 + $0x78] sm:$0xff] %v1011_v55  ;;  %v1074_v3 = vld [vmem:[%s1949_s17 + $0x58] sm:$0xff] (%p1865_p10) }
 0x1c7   : > { %1053 = vst [vmem:[%s1039_s25] sm:$0xff] %v1052_v56  ;;  %1055 = vst [vmem:[%s1039_s25 + $0x8] sm:$0xff] %v1054_v57 }
 0x1c8   : > { %1057 = vst [vmem:[%s1039_s25 + $0x20] sm:$0xff] %v1056_v58  ;;  %1059 = vst [vmem:[%s1039_s25 + $0x28] sm:$0xff] %v1058_v59 }
 0x1c9   : > { %1069 = vst [vmem:[%s1039_s25 + $0x80] sm:$0xff] %v1068_v0  ;;  %1071 = vst [vmem:[%s1039_s25 + $0x88] sm:$0xff] %v1070_v1 }
 0x1ca   : > { %v1060_v60 = vld [vmem:[%s1949_s17 + $0x20] sm:$0xff]  ;;  %1073 = vst [vmem:[%s1039_s25 + $0xa0] sm:$0xff] %v1072_v2  ;;  %1075 = vst [vmem:[%s1039_s25 + $0xa8] sm:$0xff] %v1074_v3 }
 0x1cb   : > { %v1062_v61 = vld [vmem:[%s1949_s17 + $0x28] sm:$0xff]  ;;  %1061 = vst [vmem:[%s1039_s25 + $0x40] sm:$0xff] %v1060_v60  ;;  %v1076_v4 = vld [vmem:[%s1949_s17 + $0x60] sm:$0xff] }
 0x1cc   : > { %v1064_v62 = vld [vmem:[%s1949_s17 + $0x30] sm:$0xff]  ;;  %1063 = vst [vmem:[%s1039_s25 + $0x48] sm:$0xff] %v1062_v61  ;;  %v1078_v5 = vld [vmem:[%s1949_s17 + $0x68] sm:$0xff]  ;;  %1077 = vst [vmem:[%s1039_s25 + $0xc0] sm:$0xff] %v1076_v4 }
 0x1cd   : > { %v1066_v63 = vld [vmem:[%s1949_s17 + $0x38] sm:$0xff]  ;;  %1065 = vst [vmem:[%s1039_s25 + $0x60] sm:$0xff] %v1064_v62  ;;  %v1080_v6 = vld [vmem:[%s1949_s17 + $0x70] sm:$0xff]  ;;  %1079 = vst [vmem:[%s1039_s25 + $0xc8] sm:$0xff] %v1078_v5 }
 0x1ce   : > { %1067 = vst [vmem:[%s1039_s25 + $0x68] sm:$0xff] %v1066_v63  ;;  %1081 = vst [vmem:[%s1039_s25 + $0xe0] sm:$0xff] %v1080_v6  ;;  %v1082_v7 = vld [vmem:[%s1949_s17 + $0x78] sm:$0xff] }
 0x1cf   : > { %1083 = vst [vmem:[%s1039_s25 + $0xe8] sm:$0xff] %v1082_v7 }
 0x1d0 PF: > { %s14_s23 = sadd.s32 1, %s1720_s23   ;;  %s2031_s19 = sld [smem:[#allocation5_spill]] }
 0x1d1   : > { %p11_p3 = scmp.ge.s32.totalorder %s14_s23, 6   ;;  %s2032_s21 = sld [smem:[#allocation6_spill]] }
 0x1d2   : > { %s2033_s28 = sld [smem:[#allocation7_spill]]  ;;  %s2034_s15 = smov %s1692_s16 }
 0x1d3   : > { %s2035_s16 = smov %s1854_s14  ;;  %s2036_s17 = smov %s1700_s18 }
 0x1d4   : > { %s2037_s18 = smov %s1851_s13  ;;  %s2038_s20 = smov %s1716_s22 }
 0x1d5   :  { %13 = sbr.rel (!%p11_p3) target bundleno = 5 (0x5), region = 271 }
 0x1d8   : > { %s2039_s22 = smov %s2033_s28 }

</bundles_post_ra>
